<compile_context>
chip_gen: v7x
topology: tpu7x:2x2x1
jax: 0.10.0
libtpu: 0.0.40
codegen_flags: <defaults>
</compile_context>

<pallas_src>
import jax
import jax.numpy as jnp
from jax.experimental import pallas as pl
from jax.experimental.pallas import tpu as pltpu


def _fm_kernel(x_ref, o_ref):
    # x_ref: (TB, F, D) block in VMEM, o_ref: (TB, D) block in VMEM
    x = x_ref[...]
    if x.dtype != jnp.float32:
        x = x.astype(jnp.float32)          # accumulate narrow dtypes in f32
    s = jnp.sum(x, axis=1)                 # (TB, D)
    sq = jnp.sum(x * x, axis=1)            # (TB, D)
    cross = 0.5 * (s * s - sq)             # (TB, D)
    o_ref[...] = cross.astype(o_ref.dtype)


def _choose_tb(B, F, D, itemsize, target_bytes=4 * 1024 * 1024):
    """Pick a batch tile so the input block is ~4 MiB (v7x-safe, amortizes
    per-grid-step overhead on all generations)."""
    rows = max(1, target_bytes // max(1, F * D * itemsize))
    tb = min(B, rows)
    if tb >= 8:
        tb = (tb // 8) * 8  # keep output block sublane-aligned when possible
    return max(1, tb)


def fm_forward(x, tb=None):
    """x: (B, F, D) -> (B, 1, D), matching the PyTorch FM module."""
    B, F, D = x.shape
    if tb is None:
        tb = _choose_tb(B, F, D, jnp.dtype(x.dtype).itemsize)
    tb = min(tb, B)

    out = pl.pallas_call(
        _fm_kernel,
        out_shape=jax.ShapeDtypeStruct((B, D), x.dtype),
        grid_spec=pltpu.PrefetchScalarGridSpec(
            num_scalar_prefetch=0,
            grid=(pl.cdiv(B, tb),),
            in_specs=[pl.BlockSpec((tb, F, D), lambda b: (b, 0, 0))],
            out_specs=pl.BlockSpec((tb, D), lambda b: (b, 0)),
        ),
        compiler_params=pltpu.CompilerParams(
            dimension_semantics=("parallel",),
        ),
    )(x)
    # Free (contiguous) reshape back to the module's (B, 1, D) output layout.
    return out.reshape(B, 1, D)


def fm_reference(x):
    square_of_sum = jnp.sum(x, axis=1, keepdims=True) ** 2
    sum_of_square = jnp.sum(x * x, axis=1, keepdims=True)
    return 0.5 * (square_of_sum - sum_of_square)


if __name__ == "__main__":
    key = jax.random.PRNGKey(0)

    # Small shape consistent with the module: batch=2, num_fields=8, embed_dim=32
    B, F, D = 2, 8, 32
    x = jax.random.normal(key, (B, F, D), dtype=jnp.float32)

    out = fm_forward(x)
    out = jax.block_until_ready(out)
    ref = fm_reference(x)
    assert out.shape == (B, 1, D), out.shape
    assert jnp.allclose(out, ref, atol=1e-5, rtol=1e-5), "mismatch vs reference"

    # Second check exercising multi-block tiling + a partial last batch tile.
    B2 = 300
    x2 = jax.random.normal(jax.random.PRNGKey(1), (B2, F, D), dtype=jnp.float32)
    out2 = jax.block_until_ready(fm_forward(x2, tb=128))
    ref2 = fm_reference(x2)
    assert out2.shape == (B2, 1, D), out2.shape
    assert jnp.allclose(out2, ref2, atol=1e-5, rtol=1e-5), "mismatch vs reference (tiled)"

    print("KERNEL_OK")
</pallas_src>

<mosaic_0001>
module attributes {stable_mosaic.version = 11 : i64} {
  func.func @_fm_kernel(%arg0: i32, %arg1: memref<2x8x32xf32, #tpu.memory_space<vmem>>, %arg2: memref<2x32xf32, #tpu.memory_space<vmem>>) attributes {dimension_semantics = [#tpu.dimension_semantics<parallel>], iteration_bounds = array<i64: 1>, scalar_prefetch = 0 : i64, scratch_operands = 0 : i64, tpu.core_type = #tpu.core_type<tc>, window_params = [{transform_indices = @transform_0, window_bounds = array<i64: 2, 8, 32>}, {transform_indices = @transform_1, window_bounds = array<i64: 2, 32>}]} {
    %c0 = arith.constant 0 : index
    %c0_0 = arith.constant 0 : index
    %c0_1 = arith.constant 0 : index
    %0 = vector.load %arg1[%c0, %c0_0, %c0_1] : memref<2x8x32xf32, #tpu.memory_space<vmem>>, vector<2x8x32xf32>
    %cst = arith.constant dense<0.000000e+00> : vector<2x32xf32>
    %1 = vector.multi_reduction <add>, %0, %cst [1] : vector<2x8x32xf32> to vector<2x32xf32>
    %2 = arith.mulf %0, %0 : vector<2x8x32xf32>
    %cst_2 = arith.constant dense<0.000000e+00> : vector<2x32xf32>
    %3 = vector.multi_reduction <add>, %2, %cst_2 [1] : vector<2x8x32xf32> to vector<2x32xf32>
    %4 = arith.mulf %1, %1 : vector<2x32xf32>
    %5 = arith.subf %4, %3 : vector<2x32xf32>
    %cst_3 = arith.constant 5.000000e-01 : f32
    %6 = vector.broadcast %cst_3 : f32 to vector<2x32xf32>
    %7 = arith.mulf %6, %5 : vector<2x32xf32>
    %c0_4 = arith.constant 0 : index
    %c0_5 = arith.constant 0 : index
    %8 = vector.load %arg2[%c0_4, %c0_5] : memref<2x32xf32, #tpu.memory_space<vmem>>, vector<2x32xf32>
    tpu.vector_store %arg2[%c0_4, %c0_5], %7 {strides = array<i32>} : memref<2x32xf32, #tpu.memory_space<vmem>>, vector<2x32xf32>,
    return
  }
  func.func @transform_0(%arg0: i32) -> (i32, i32, i32) {
    %c0_i32 = arith.constant 0 : i32
    %c0_i32_0 = arith.constant 0 : i32
    %c0_i32_1 = arith.constant 0 : i32
    return %arg0, %c0_i32, %c0_i32_0 : i32, i32, i32
  }
  func.func @transform_1(%arg0: i32) -> (i32, i32) {
    %c0_i32 = arith.constant 0 : i32
    %c0_i32_0 = arith.constant 0 : i32
    return %arg0, %c0_i32 : i32, i32
  }
}

</mosaic_0001>

<bundles_post_ra>
// kernel: tpu_custom_call.1
= control target key start
LH: loop header
LB: loop body
LE: loop exit
PB: predicated region body
PF: predicated region fallthrough
CT: control target
= control target key end

     0   :  { %6 = vsyncpa [#allocation3], 0  ;;  %s174_s0 = inlined_call_operand.hbm [shape: f32[2,8,32], index: 0, kind: input, shape index: {}]   ;;  %s175_s1 = inlined_call_operand.hbm [shape: f32[2,32], index: 1, kind: output, shape index: {}]  }
   0x1   :  { %7 = vsyncpa [#allocation4], 0  ;;  %s136_s6 = smov [#allocation2]   ;;  %s88_s10 = scalar_lea.hbm %s174_s0, 256 }
   0x2   :  { %s13_s7 = sshll.u32 %s136_s6, 4  ;;  %p89_p0 = scmp.ne.s32.totalorder %s174_s0, %s88_s10  ;;  %s14_s7 = int_to_ptr.vmem [resolvable:$true] %s13_s7 }
   0x3   :  { %p92_p1 = scmp.lt.u32.totalorder %s88_s10, %s174_s0 }
   0x5   :  { %p94_p2 = pnand %p92_p1, %p89_p0 }
   0x7   :  { %97 = shalt.err (!%p94_p2)
}
   0x8   :  { %s98_s15 = scalar_lea.vmem %s14_s7, 256  ;;  %p103_p4 = scmp.lt.s32.totalorder %s14_s7, %s14_s7 }
   0x9   :  { %p99_p3 = scmp.ne.s32.totalorder %s14_s7, %s98_s15  ;;  %p104_p5 = scmp.lt.s32.totalorder %s98_s15, %s98_s15 }
   0xb   :  { %p105_p6 = por %p104_p5, %p103_p4 }
   0xd   :  { %p106_p7 = pnand %p105_p6, %p99_p3 }
   0xf   :  { %109 = shalt.err (!%p106_p7)
}
  0x10   :  { %s137_s16 = smov 128   ;;  %s138_s17 = smov 8  }
  0x11   :  { %19 = dma.hbm_to_vmem [thread:$0]  %s174_s0, 256, %s14_s7, [#allocation3], %s137_s16, %s137_s16, %s138_s17  }
  0x12   :  { %132 = dma.done.wait [#allocation3], 256  }
  0x13   :  { %133 = vsyncadd [#allocation3], 4294967040  ;;  %vm25_vm0 = vcmask 261120   ;;  %v23_v0 = vld [vmem:[#allocation2] sm:$0xff]  ;;  %v24_v1 = vld [vmem:[#allocation2 + $0x8] sm:$0xff]  ;;  %s139_s0 = smov [#allocation5]  }
  0x14   :  { %v26_v2 = vsel %vm25_vm0, %v23_v0, 0.0  ;;  %v33_v3 = vsel %vm25_vm0, %v24_v1, 0.0  ;;  %v40_v4 = vmul.f32 %v23_v0, %v23_v0  ;;  %v41_v5 = vmul.f32 %v24_v1, %v24_v1  ;;  %s75_s20 = sshll.u32 %s139_s0, 4  ;;  %s76_s20 = int_to_ptr.vmem [resolvable:$true] %s75_s20 }
  0x15   :  { %v27_v6 = vrot.slane %v26_v2, 4  ;;  %v34_v7 = vrot.slane %v33_v3, 4  ;;  %vm64_vm1 = vcmask 1041409   ;;  %vm67_vm2 = vcmask 254976   ;;  %s110_s21 = scalar_lea.vmem %s76_s20, 32  ;;  %p115_p9 = scmp.lt.s32.totalorder %s76_s20, %s76_s20 }
  0x16   :  { %v42_v8 = vsel %vm25_vm0, %v40_v4, 0.0  ;;  %v49_v9 = vsel %vm25_vm0, %v41_v5, 0.0  ;;  %p111_p8 = scmp.ne.s32.totalorder %s76_s20, %s110_s21  ;;  %p116_p10 = scmp.lt.s32.totalorder %s110_s21, %s110_s21 }
  0x17   :  { %v28_v10 = vadd.f32 %v27_v6, %v26_v2  ;;  %v35_v11 = vadd.f32 %v34_v7, %v33_v3  ;;  %v43_v12 = vrot.slane %v42_v8, 4  ;;  %v50_v13 = vrot.slane %v49_v9, 4 }
  0x18   :  { %p117_p11 = por %p116_p10, %p115_p9 }
  0x19   :  { %v29_v14 = vrot.slane %v28_v10, 2  ;;  %v36_v15 = vrot.slane %v35_v11, 2  ;;  %v44_v16 = vadd.f32 %v43_v12, %v42_v8  ;;  %v51_v17 = vadd.f32 %v50_v13, %v49_v9 }
  0x1a   :  { %p118_p12 = pnand %p117_p11, %p111_p8 }
  0x1b   :  { %v30_v18 = vadd.f32 %v29_v14, %v28_v10  ;;  %v37_v19 = vadd.f32 %v36_v15, %v35_v11  ;;  %v45_v20 = vrot.slane %v44_v16, 2  ;;  %v52_v21 = vrot.slane %v51_v17, 2 }
  0x1d   :  { %v31_v22 = vrot.slane %v30_v18, 1  ;;  %v38_v23 = vrot.slane %v37_v19, 1  ;;  %v46_v24 = vadd.f32 %v45_v20, %v44_v16  ;;  %v53_v25 = vadd.f32 %v52_v21, %v51_v17 }
  0x1f   :  { %v32_v26 = vadd.f32 %v31_v22, %v30_v18  ;;  %v39_v27 = vadd.f32 %v38_v23, %v37_v19  ;;  %v47_v28 = vrot.slane %v46_v24, 1  ;;  %v54_v29 = vrot.slane %v53_v25, 1 }
  0x21   :  { %v48_v30 = vadd.f32 %v47_v28, %v46_v24  ;;  %v55_v31 = vadd.f32 %v54_v29, %v53_v25  ;;  %v56_v32 = vmul.f32 %v32_v26, %v32_v26  ;;  %v57_v33 = vmul.f32 %v39_v27, %v39_v27 }
  0x23   :  { %v58_v34 = vsub.f32 %v56_v32, %v48_v30  ;;  %v59_v35 = vsub.f32 %v57_v33, %v55_v31 }
  0x25   :  { %v60_v36 = vmul.f32 0.5, %v58_v34  ;;  %v61_v37 = vmul.f32 0.5, %v59_v35 }
  0x27   :  { %v65_v38 = vsel %vm64_vm1, %v61_v37, %v60_v36 }
  0x28   :  { %68 = vst.msk [vmem:[#allocation5] sm:$0x3] %vm67_vm2, %v65_v38 }
  0x29   :  { %121 = shalt.err (!%p118_p12)
}
  0x2a   :  { %s122_s24 = scalar_lea.hbm %s175_s1, 32 }
  0x2b   :  { %p123_p13 = scmp.ne.s32.totalorder %s175_s1, %s122_s24  ;;  %p126_p0 = scmp.lt.u32.totalorder %s122_s24, %s175_s1 }
  0x2d   :  { %p128_p1 = pnand %p126_p0, %p123_p13 }
  0x2f   :  { %131 = shalt.err (!%p128_p1)
}
  0x30   :  { %78 = dma.vmem_to_hbm [thread:$0]  %s76_s20, 32, %s175_s1, [#allocation4]  }
  0x31   :  { %134 = dma.done.wait [#allocation4], 32  }
  0x32   :  { %135 = vsyncadd [#allocation4], 4294967264 }
  0x33   :  { %82 = vsyncpa [#allocation3], 1 }
  0x34   :  { %83 = vsyncpa [#allocation4], 1 }

</bundles_post_ra>
